<compile_context>
chip_gen: v5e
topology: v5e:2x2
jax: 0.10.0
libtpu: 0.0.40
codegen_flags: <defaults>
</compile_context>

<pallas_src>
import jax
import jax.numpy as jnp
from jax import lax
from jax.experimental import pallas as pl
from jax.experimental.pallas import tpu as pltpu

_LRELU_SLOPE = 0.01   # PyTorch nn.LeakyReLU default negative_slope
_BN_EPS = 1e-5


def _round_up(n, m):
    return ((n + m - 1) // m) * m


# ---------------------------------------------------------------------------
# Pallas kernel: the whole SpectralTransform forward for a block of Bt batch
# elements.  Data layout is (channels, H*W): channels on sublanes, flattened
# spatial dim on lanes, so every matmul result / store is lane-dense.
# ---------------------------------------------------------------------------
def _spectral_transform_kernel(x_ref, w1_ref, b1_ref, fdft_ref, wfu_ref,
                               bfu_ref, idft_ref, w2_ref, o_ref,
                               x1_scr, z_scr, t_scr):
    bt = x_ref.shape[0]
    cmid = w1_ref.shape[0]
    spad = fdft_ref.shape[1] // 2   # 128-padded half-spectrum size

    def mm(a, b):
        return jnp.dot(a, b, preferred_element_type=jnp.float32)

    def lrelu(v):
        return jnp.where(v > 0, v, _LRELU_SLOPE * v)

    w1 = w1_ref[...]                      # bf16 (Cmid, Cin)
    b1 = b1_ref[...]                      # f32  (Cmid, 1)
    # conv1 (1x1, BN folded) + LeakyReLU -- FLOP trivial, per batch element,
    # writing rows [b*Cmid, (b+1)*Cmid) of the (Bt*Cmid, HW) scratch.
    for b in range(bt):
        xb = x_ref[b].astype(jnp.bfloat16)                           # (Cin, HW)
        x1_scr[pl.ds(b * cmid, cmid), :] = lrelu(mm(w1, xb) + b1)    # f32

    # rfft2 (norm='ortho') for the whole batch block in ONE matmul:
    # rows = Bt*Cmid "channels", cols = [re | im] of the padded half-spectrum.
    z_scr[...] = mm(x1_scr[...].astype(jnp.bfloat16), fdft_ref[...])

    # spectral 1x1 conv (BN folded) + LeakyReLU.  Per batch element: gather
    # [re ; im] rows, one (2*Cmid, 2*Cmid) matmul, scatter back to the
    # [re | im] column layout expected by the inverse-DFT matmul.
    wfu = wfu_ref[...]                    # bf16 (2Cmid, 2Cmid)
    bfu = bfu_ref[...]                    # f32  (2Cmid, 1)
    for b in range(bt):
        r0 = b * cmid
        zs = jnp.concatenate(
            [z_scr[pl.ds(r0, cmid), pl.ds(0, spad)],
             z_scr[pl.ds(r0, cmid), pl.ds(spad, spad)]],
            axis=0).astype(jnp.bfloat16)                             # (2Cmid, Spad)
        t = lrelu(mm(wfu, zs) + bfu)                                 # (2Cmid, Spad) f32
        t_scr[pl.ds(r0, cmid), pl.ds(0, spad)] = t[:cmid].astype(t_scr.dtype)
        t_scr[pl.ds(r0, cmid), pl.ds(spad, spad)] = t[cmid:].astype(t_scr.dtype)

    # irfft2 (norm='ortho') for the whole batch block in ONE matmul; padded
    # spectral columns hit zero rows of the inverse matrix, so they drop out.
    fu = mm(t_scr[...], idft_ref[...])                               # (Bt*Cmid, HW) f32

    # residual add (reuse the x1 scratch), then conv2 (1x1, no norm / act).
    x1_scr[...] = x1_scr[...] + fu
    w2 = w2_ref[...]                      # bf16 (Cout, Cmid)
    for b in range(bt):
        yb = x1_scr[pl.ds(b * cmid, cmid), :].astype(jnp.bfloat16)   # (Cmid, HW)
        o_ref[b] = mm(w2, yb).astype(o_ref.dtype)                    # (Cout, HW)


# ---------------------------------------------------------------------------
# Dense real-DFT matrices for rfft2 / irfft2 (norm='ortho')
# ---------------------------------------------------------------------------
def _rdft2_matrices(H, W):
    Wf = W // 2 + 1
    scale = 1.0 / float(H * W) ** 0.5
    h = jnp.arange(H, dtype=jnp.float32)
    w = jnp.arange(W, dtype=jnp.float32)
    u = jnp.arange(H, dtype=jnp.float32)
    v = jnp.arange(Wf, dtype=jnp.float32)

    # forward: rows = (h, w) pixels, cols = (u, v) half-spectrum bins
    ang_f = 2.0 * jnp.pi * (h[:, None, None, None] * u[None, None, :, None] / H +
                            w[None, :, None, None] * v[None, None, None, :] / W)
    mc = (jnp.cos(ang_f) * scale).reshape(H * W, H * Wf)
    ms = (-jnp.sin(ang_f) * scale).reshape(H * W, H * Wf)

    # inverse: rows = (u, v) bins weighted by half-spectrum multiplicity,
    # cols = (h, w) pixels.  cv=1 on the DC / Nyquist columns (no conjugate
    # partner); both re and im of those columns still contribute through the
    # complex inverse along the first axis, matching torch.fft.irfftn /
    # jnp.fft.irfft2 (C2R applied to the last axis only).
    idx = jnp.arange(Wf)
    if W % 2 == 0:
        cv = jnp.where((idx == 0) | (idx == W // 2), 1.0, 2.0).astype(jnp.float32)
    else:
        cv = jnp.where(idx == 0, 1.0, 2.0).astype(jnp.float32)
    ang_i = 2.0 * jnp.pi * (u[:, None, None, None] * h[None, None, :, None] / H +
                            v[None, :, None, None] * w[None, None, None, :] / W)
    nc = (cv[None, :, None, None] * jnp.cos(ang_i) * scale).reshape(H * Wf, H * W)
    ns = (-cv[None, :, None, None] * jnp.sin(ang_i) * scale).reshape(H * Wf, H * W)
    return mc, ms, nc, ns


def _fold_bn(gamma, beta, mean, var, eps=_BN_EPS):
    scale = gamma * lax.rsqrt(var + eps)
    return scale, beta - mean * scale


# ---------------------------------------------------------------------------
# Wrapper: fold BN, permute spectral weights, build padded DFT matrices,
# pick the batch tile, and call the fused kernel.
# ---------------------------------------------------------------------------
@jax.jit
def spectral_transform_forward(params, x_nchw):
    """x_nchw: (B, Cin, H, W) -> (B, Cout, H, W)."""
    B, Cin, H, W = x_nchw.shape
    w1, wfu, w2 = params['w1'], params['wfu'], params['w2']
    Cmid = w1.shape[0]
    Cout = w2.shape[0]
    HW = H * W
    HWf = H * (W // 2 + 1)
    Spad = _round_up(HWf, 128)            # lane-tile-aligned half-spectrum

    # ---- fold BatchNorm (inference) into conv weights / per-channel shifts
    s1, b1 = _fold_bn(*params['bn1'])
    w1_eff = (w1 * s1[:, None]).astype(jnp.bfloat16)
    b1 = b1.reshape(Cmid, 1).astype(jnp.float32)

    sf, bf = _fold_bn(*params['bnf'])
    # PyTorch interleaves spectral channels as [c0_re, c0_im, c1_re, ...];
    # permute weight / BN to a stacked [re-block ; im-block] layout so the
    # kernel works directly on stacked (z_re ; z_im) rows.
    perm = jnp.concatenate([jnp.arange(Cmid) * 2, jnp.arange(Cmid) * 2 + 1])
    wfu_eff = ((wfu[perm][:, perm]) * sf[perm][:, None]).astype(jnp.bfloat16)
    bfu = bf[perm].reshape(2 * Cmid, 1).astype(jnp.float32)

    w2_bf = w2.astype(jnp.bfloat16)

    # ---- padded + fused DFT matrices (forward: [cos | -sin], inverse stacked)
    mc, ms, nc, ns = _rdft2_matrices(H, W)
    pad_c = Spad - HWf
    fdft = jnp.concatenate(
        [jnp.pad(mc, ((0, 0), (0, pad_c))), jnp.pad(ms, ((0, 0), (0, pad_c)))],
        axis=1).astype(jnp.bfloat16)                        # (HW, 2*Spad)
    idft = jnp.concatenate(
        [jnp.pad(nc, ((0, pad_c), (0, 0))), jnp.pad(ns, ((0, pad_c), (0, 0)))],
        axis=0).astype(jnp.bfloat16)                        # (2*Spad, HW)

    # ---- batch tiling: fill MXU rows (target ~256) but keep >= 2 grid steps
    # when B > 1 so both v7x TensorCores get a share.
    bt = max(1, min(B, 256 // max(Cmid, 1)))
    if B > 1 and pl.cdiv(B, bt) < 2:
        bt = pl.cdiv(B, 2)
    num_blocks = pl.cdiv(B, bt)
    b_pad = num_blocks * bt

    x_flat = x_nchw.reshape(B, Cin, HW)
    if b_pad != B:
        x_flat = jnp.pad(x_flat, ((0, b_pad - B), (0, 0), (0, 0)))

    def const_spec(a):
        return pl.BlockSpec(a.shape, lambda g: (0,) * a.ndim)

    operands = (x_flat, w1_eff, b1, fdft, wfu_eff, bfu, idft, w2_bf)
    in_specs = [pl.BlockSpec((bt, Cin, HW), lambda g: (g, 0, 0))]
    in_specs += [const_spec(a) for a in operands[1:]]

    itemsize = jnp.dtype(x_nchw.dtype).itemsize
    flops = 2 * b_pad * (Cmid * Cin * HW                  # conv1
                         + Cmid * HW * 2 * Spad           # forward DFT
                         + (2 * Cmid) * (2 * Cmid) * Spad  # spectral conv
                         + Cmid * 2 * Spad * HW           # inverse DFT
                         + Cout * Cmid * HW)              # conv2
    bytes_accessed = (x_flat.size * itemsize + b_pad * Cout * HW * itemsize
                      + 2 * (fdft.size + idft.size + w1_eff.size
                             + wfu_eff.size + w2_bf.size)
                      + 4 * (b1.size + bfu.size))

    out_flat = pl.pallas_call(
        _spectral_transform_kernel,
        out_shape=jax.ShapeDtypeStruct((b_pad, Cout, HW), x_nchw.dtype),
        grid=(num_blocks,),
        in_specs=in_specs,
        out_specs=pl.BlockSpec((bt, Cout, HW), lambda g: (g, 0, 0)),
        scratch_shapes=[
            pltpu.VMEM((bt * Cmid, HW), jnp.float32),        # x1 / residual
            pltpu.VMEM((bt * Cmid, 2 * Spad), jnp.float32),  # forward-DFT out
            pltpu.VMEM((bt * Cmid, 2 * Spad), jnp.bfloat16),  # spectral-conv out
        ],
        compiler_params=pltpu.CompilerParams(
            dimension_semantics=("parallel",),
            vmem_limit_bytes=32 * 1024 * 1024),
        cost_estimate=pl.CostEstimate(flops=int(flops), transcendentals=0,
                                      bytes_accessed=int(bytes_accessed)),
    )(*operands)
    return out_flat[:B].reshape(B, Cout, H, W)


# ---------------------------------------------------------------------------
# Deterministic parameter init (PyTorch-layout weights + raw BN statistics)
# ---------------------------------------------------------------------------
def init_spectral_transform_params(key, in_channels, out_channels):
    cmid = out_channels // 2
    ks = jax.random.split(key, 11)

    def bn_params(kg, kb, km, kv, c):
        gamma = 1.0 + 0.1 * jax.random.normal(kg, (c,), jnp.float32)
        beta = 0.1 * jax.random.normal(kb, (c,), jnp.float32)
        mean = 0.1 * jax.random.normal(km, (c,), jnp.float32)
        var = jnp.abs(jax.random.normal(kv, (c,), jnp.float32)) + 0.5
        return gamma, beta, mean, var

    return {
        'w1': 0.1 * jax.random.normal(ks[0], (cmid, in_channels), jnp.float32),
        'bn1': bn_params(ks[1], ks[2], ks[3], ks[4], cmid),
        'wfu': 0.1 * jax.random.normal(ks[5], (2 * cmid, 2 * cmid), jnp.float32),
        'bnf': bn_params(ks[6], ks[7], ks[8], ks[9], 2 * cmid),
        'w2': 0.1 * jax.random.normal(ks[10], (out_channels, cmid), jnp.float32),
    }


# ---------------------------------------------------------------------------
# Pure-JAX reference (follows the PyTorch module, uses jnp.fft for the FFTs)
# ---------------------------------------------------------------------------
def spectral_transform_reference(params, x):
    B, Cin, H, W = x.shape
    Cmid = params['w1'].shape[0]
    hi = lax.Precision.HIGHEST

    def conv1x1(w, t):
        return jnp.einsum('oi,bihw->bohw', w, t, precision=hi)

    def lrelu(v):
        return jnp.where(v > 0, v, _LRELU_SLOPE * v)

    s1, b1 = _fold_bn(*params['bn1'])
    x1 = lrelu(conv1x1(params['w1'], x)
               * s1[None, :, None, None] + b1[None, :, None, None])

    ff = jnp.fft.rfft2(x1, norm='ortho')                   # (B, Cmid, H, Wf)
    Wf = ff.shape[-1]
    st = jnp.stack([ff.real, ff.imag], axis=2)             # (B, Cmid, 2, H, Wf)
    st = st.reshape(B, 2 * Cmid, H, Wf)                    # interleaved channels
    sf, bf = _fold_bn(*params['bnf'])
    t = lrelu(conv1x1(params['wfu'], st)
              * sf[None, :, None, None] + bf[None, :, None, None])
    t = t.reshape(B, Cmid, 2, H, Wf)
    fu = jnp.fft.irfft2(t[:, :, 0] + 1j * t[:, :, 1], s=(H, W), norm='ortho')
    return conv1x1(params['w2'], x1 + fu)


if __name__ == "__main__":
    key = jax.random.PRNGKey(0)
    k_params, k_x = jax.random.split(key)

    B, Cin, Cout, H, W = 2, 16, 16, 16, 16
    x = jax.random.normal(k_x, (B, Cin, H, W), jnp.float32)
    params = init_spectral_transform_params(k_params, Cin, Cout)

    out = spectral_transform_forward(params, x)
    out = jax.block_until_ready(out)

    ref = spectral_transform_reference(params, x)
    assert out.shape == (B, Cout, H, W), out.shape
    err = float(jnp.max(jnp.abs(out - ref)))
    # bf16 matmul operands (f32 accumulation) -> relaxed vs the old f32 5e-3.
    assert err < 5e-2, f"max abs err {err}"
    print("KERNEL_OK")
</pallas_src>

<mosaic_0001>
module attributes {stable_mosaic.version = 11 : i64} {
  func.func @_spectral_transform_kernel(%arg0: i32, %arg1: memref<1x16x256xf32, #tpu.memory_space<vmem>>, %arg2: memref<8x16xbf16, #tpu.memory_space<vmem>>, %arg3: memref<8x1xf32, #tpu.memory_space<vmem>>, %arg4: memref<256x512xbf16, #tpu.memory_space<vmem>>, %arg5: memref<16x16xbf16, #tpu.memory_space<vmem>>, %arg6: memref<16x1xf32, #tpu.memory_space<vmem>>, %arg7: memref<512x256xbf16, #tpu.memory_space<vmem>>, %arg8: memref<16x8xbf16, #tpu.memory_space<vmem>>, %arg9: memref<1x16x256xf32, #tpu.memory_space<vmem>>, %arg10: memref<8x256xf32, #tpu.memory_space<vmem>>, %arg11: memref<8x512xf32, #tpu.memory_space<vmem>>, %arg12: memref<8x512xbf16, #tpu.memory_space<vmem>>) attributes {dimension_semantics = [#tpu.dimension_semantics<parallel>], iteration_bounds = array<i64: 2>, scalar_prefetch = 0 : i64, scratch_operands = 3 : i64, tpu.core_type = #tpu.core_type<tc>, window_params = [{transform_indices = @transform_0, window_bounds = array<i64: 1, 16, 256>}, {pipeline_mode = #tpu.pipeline_mode<synchronous>, transform_indices = @transform_1, window_bounds = array<i64: 8, 16>}, {pipeline_mode = #tpu.pipeline_mode<synchronous>, transform_indices = @transform_2, window_bounds = array<i64: 8, 1>}, {pipeline_mode = #tpu.pipeline_mode<synchronous>, transform_indices = @transform_3, window_bounds = array<i64: 256, 512>}, {pipeline_mode = #tpu.pipeline_mode<synchronous>, transform_indices = @transform_4, window_bounds = array<i64: 16, 16>}, {pipeline_mode = #tpu.pipeline_mode<synchronous>, transform_indices = @transform_5, window_bounds = array<i64: 16, 1>}, {pipeline_mode = #tpu.pipeline_mode<synchronous>, transform_indices = @transform_6, window_bounds = array<i64: 512, 256>}, {pipeline_mode = #tpu.pipeline_mode<synchronous>, transform_indices = @transform_7, window_bounds = array<i64: 16, 8>}, {transform_indices = @transform_8, window_bounds = array<i64: 1, 16, 256>}]} {
    %c0 = arith.constant 0 : index
    %c0_0 = arith.constant 0 : index
    %0 = vector.load %arg2[%c0, %c0_0] : memref<8x16xbf16, #tpu.memory_space<vmem>>, vector<8x16xbf16>
    %c0_1 = arith.constant 0 : index
    %c0_2 = arith.constant 0 : index
    %1 = vector.load %arg3[%c0_1, %c0_2] : memref<8x1xf32, #tpu.memory_space<vmem>>, vector<8x1xf32>
    %c0_3 = arith.constant 0 : index
    %c0_4 = arith.constant 0 : index
    %c0_5 = arith.constant 0 : index
    %2 = vector.load %arg1[%c0_3, %c0_4, %c0_5] : memref<1x16x256xf32, #tpu.memory_space<vmem>>, vector<1x16x256xf32>
    %3 = vector.shape_cast %2 : vector<1x16x256xf32> to vector<16x256xf32>
    %4 = arith.truncf %3 : vector<16x256xf32> to vector<16x256xbf16>
    %cst = arith.constant dense<0.000000e+00> : vector<8x256xf32>
    %5 = tpu.matmul %0, %4, %cst {dimension_numbers = #tpu.dot_dimension_numbers<[1], [0], [0], [1], [0, 0, 1, 1], [], []>} : vector<8x16xbf16>, vector<16x256xbf16>, vector<8x256xf32> -> vector<8x256xf32>
    %6 = vector.broadcast %1 : vector<8x1xf32> to vector<8x256xf32>
    %7 = arith.addf %5, %6 : vector<8x256xf32>
    %cst_6 = arith.constant 0.000000e+00 : f32
    %8 = vector.broadcast %cst_6 : f32 to vector<8x256xf32>
    %9 = arith.cmpf ogt, %7, %8 : vector<8x256xf32>
    %cst_7 = arith.constant 0.00999999977 : f32
    %10 = vector.broadcast %cst_7 : f32 to vector<8x256xf32>
    %11 = arith.mulf %10, %7 : vector<8x256xf32>
    %12 = arith.select %9, %7, %11 : vector<8x256xi1>, vector<8x256xf32>
    %c0_8 = arith.constant 0 : index
    %c0_9 = arith.constant 0 : index
    %13 = vector.load %arg10[%c0_8, %c0_9] : memref<8x256xf32, #tpu.memory_space<vmem>>, vector<8x256xf32>
    tpu.vector_store %arg10[%c0_8, %c0_9], %12 {strides = array<i32>} : memref<8x256xf32, #tpu.memory_space<vmem>>, vector<8x256xf32>,
    %c0_10 = arith.constant 0 : index
    %c0_11 = arith.constant 0 : index
    %14 = vector.load %arg10[%c0_10, %c0_11] : memref<8x256xf32, #tpu.memory_space<vmem>>, vector<8x256xf32>
    %15 = arith.truncf %14 : vector<8x256xf32> to vector<8x256xbf16>
    %c0_12 = arith.constant 0 : index
    %c0_13 = arith.constant 0 : index
    %16 = vector.load %arg4[%c0_12, %c0_13] : memref<256x512xbf16, #tpu.memory_space<vmem>>, vector<256x512xbf16>
    %cst_14 = arith.constant dense<0.000000e+00> : vector<8x512xf32>
    %17 = tpu.matmul %15, %16, %cst_14 {dimension_numbers = #tpu.dot_dimension_numbers<[1], [0], [0], [1], [0, 0, 1, 1], [], []>} : vector<8x256xbf16>, vector<256x512xbf16>, vector<8x512xf32> -> vector<8x512xf32>
    %c0_15 = arith.constant 0 : index
    %c0_16 = arith.constant 0 : index
    %18 = vector.load %arg11[%c0_15, %c0_16] : memref<8x512xf32, #tpu.memory_space<vmem>>, vector<8x512xf32>
    tpu.vector_store %arg11[%c0_15, %c0_16], %17 {strides = array<i32>} : memref<8x512xf32, #tpu.memory_space<vmem>>, vector<8x512xf32>,
    %c0_17 = arith.constant 0 : index
    %c0_18 = arith.constant 0 : index
    %19 = vector.load %arg5[%c0_17, %c0_18] : memref<16x16xbf16, #tpu.memory_space<vmem>>, vector<16x16xbf16>
    %c0_19 = arith.constant 0 : index
    %c0_20 = arith.constant 0 : index
    %20 = vector.load %arg6[%c0_19, %c0_20] : memref<16x1xf32, #tpu.memory_space<vmem>>, vector<16x1xf32>
    %c0_21 = arith.constant 0 : index
    %c0_22 = arith.constant 0 : index
    %21 = vector.load %arg11[%c0_21, %c0_22] : memref<8x512xf32, #tpu.memory_space<vmem>>, vector<8x256xf32>
    %c0_23 = arith.constant 0 : index
    %c256 = arith.constant 256 : index
    %22 = vector.load %arg11[%c0_23, %c256] : memref<8x512xf32, #tpu.memory_space<vmem>>, vector<8x256xf32>
    %23 = tpu.concatenate %21, %22 in 0 : vector<8x256xf32>, vector<8x256xf32> -> vector<16x256xf32>
    %24 = arith.truncf %23 : vector<16x256xf32> to vector<16x256xbf16>
    %cst_24 = arith.constant dense<0.000000e+00> : vector<16x256xf32>
    %25 = tpu.matmul %19, %24, %cst_24 {dimension_numbers = #tpu.dot_dimension_numbers<[1], [0], [0], [1], [0, 0, 1, 1], [], []>} : vector<16x16xbf16>, vector<16x256xbf16>, vector<16x256xf32> -> vector<16x256xf32>
    %26 = vector.broadcast %20 : vector<16x1xf32> to vector<16x256xf32>
    %27 = arith.addf %25, %26 : vector<16x256xf32>
    %cst_25 = arith.constant 0.000000e+00 : f32
    %28 = vector.broadcast %cst_25 : f32 to vector<16x256xf32>
    %29 = arith.cmpf ogt, %27, %28 : vector<16x256xf32>
    %cst_26 = arith.constant 0.00999999977 : f32
    %30 = vector.broadcast %cst_26 : f32 to vector<16x256xf32>
    %31 = arith.mulf %30, %27 : vector<16x256xf32>
    %32 = arith.select %29, %27, %31 : vector<16x256xi1>, vector<16x256xf32>
    %33 = vector.extract_strided_slice %32 {offsets = [0, 0], sizes = [8, 256], strides = [1, 1]} : vector<16x256xf32> to vector<8x256xf32>
    %34 = arith.truncf %33 : vector<8x256xf32> to vector<8x256xbf16>
    %c0_27 = arith.constant 0 : index
    %c0_28 = arith.constant 0 : index
    %35 = vector.load %arg12[%c0_27, %c0_28] : memref<8x512xbf16, #tpu.memory_space<vmem>>, vector<8x256xbf16>
    tpu.vector_store %arg12[%c0_27, %c0_28], %34 {strides = array<i32>} : memref<8x512xbf16, #tpu.memory_space<vmem>>, vector<8x256xbf16>,
    %36 = vector.extract_strided_slice %32 {offsets = [8, 0], sizes = [8, 256], strides = [1, 1]} : vector<16x256xf32> to vector<8x256xf32>
    %37 = arith.truncf %36 : vector<8x256xf32> to vector<8x256xbf16>
    %c0_29 = arith.constant 0 : index
    %c256_30 = arith.constant 256 : index
    %38 = vector.load %arg12[%c0_29, %c256_30] : memref<8x512xbf16, #tpu.memory_space<vmem>>, vector<8x256xbf16>
    tpu.vector_store %arg12[%c0_29, %c256_30], %37 {strides = array<i32>} : memref<8x512xbf16, #tpu.memory_space<vmem>>, vector<8x256xbf16>,
    %c0_31 = arith.constant 0 : index
    %c0_32 = arith.constant 0 : index
    %39 = vector.load %arg12[%c0_31, %c0_32] : memref<8x512xbf16, #tpu.memory_space<vmem>>, vector<8x512xbf16>
    %c0_33 = arith.constant 0 : index
    %c0_34 = arith.constant 0 : index
    %40 = vector.load %arg7[%c0_33, %c0_34] : memref<512x256xbf16, #tpu.memory_space<vmem>>, vector<512x256xbf16>
    %cst_35 = arith.constant dense<0.000000e+00> : vector<8x256xf32>
    %41 = tpu.matmul %39, %40, %cst_35 {dimension_numbers = #tpu.dot_dimension_numbers<[1], [0], [0], [1], [0, 0, 1, 1], [], []>} : vector<8x512xbf16>, vector<512x256xbf16>, vector<8x256xf32> -> vector<8x256xf32>
    %c0_36 = arith.constant 0 : index
    %c0_37 = arith.constant 0 : index
    %42 = vector.load %arg10[%c0_36, %c0_37] : memref<8x256xf32, #tpu.memory_space<vmem>>, vector<8x256xf32>
    %43 = arith.addf %42, %41 : vector<8x256xf32>
    %c0_38 = arith.constant 0 : index
    %c0_39 = arith.constant 0 : index
    %44 = vector.load %arg10[%c0_38, %c0_39] : memref<8x256xf32, #tpu.memory_space<vmem>>, vector<8x256xf32>
    tpu.vector_store %arg10[%c0_38, %c0_39], %43 {strides = array<i32>} : memref<8x256xf32, #tpu.memory_space<vmem>>, vector<8x256xf32>,
    %c0_40 = arith.constant 0 : index
    %c0_41 = arith.constant 0 : index
    %45 = vector.load %arg8[%c0_40, %c0_41] : memref<16x8xbf16, #tpu.memory_space<vmem>>, vector<16x8xbf16>
    %c0_42 = arith.constant 0 : index
    %c0_43 = arith.constant 0 : index
    %46 = vector.load %arg10[%c0_42, %c0_43] : memref<8x256xf32, #tpu.memory_space<vmem>>, vector<8x256xf32>
    %47 = arith.truncf %46 : vector<8x256xf32> to vector<8x256xbf16>
    %cst_44 = arith.constant dense<0.000000e+00> : vector<16x256xf32>
    %48 = tpu.matmul %45, %47, %cst_44 {dimension_numbers = #tpu.dot_dimension_numbers<[1], [0], [0], [1], [0, 0, 1, 1], [], []>} : vector<16x8xbf16>, vector<8x256xbf16>, vector<16x256xf32> -> vector<16x256xf32>
    %c0_45 = arith.constant 0 : index
    %c0_46 = arith.constant 0 : index
    %c0_47 = arith.constant 0 : index
    %49 = vector.load %arg9[%c0_45, %c0_46, %c0_47] : memref<1x16x256xf32, #tpu.memory_space<vmem>>, vector<1x16x256xf32>
    %50 = vector.shape_cast %49 : vector<1x16x256xf32> to vector<16x256xf32>
    %51 = vector.shape_cast %48 : vector<16x256xf32> to vector<1x16x256xf32>
    tpu.vector_store %arg9[%c0_45, %c0_46, %c0_47], %51 {strides = array<i32>} : memref<1x16x256xf32, #tpu.memory_space<vmem>>, vector<1x16x256xf32>,
    return
  }
  func.func @transform_0(%arg0: i32) -> (i32, i32, i32) {
    %c0_i32 = arith.constant 0 : i32
    %c0_i32_0 = arith.constant 0 : i32
    %c0_i32_1 = arith.constant 0 : i32
    return %arg0, %c0_i32, %c0_i32_0 : i32, i32, i32
  }
  func.func @transform_1(%arg0: i32) -> (i32, i32) {
    %c0_i32 = arith.constant 0 : i32
    %c0_i32_0 = arith.constant 0 : i32
    %c0_i32_1 = arith.constant 0 : i32
    return %c0_i32, %c0_i32_0 : i32, i32
  }
  func.func @transform_2(%arg0: i32) -> (i32, i32) {
    %c0_i32 = arith.constant 0 : i32
    %c0_i32_0 = arith.constant 0 : i32
    %c0_i32_1 = arith.constant 0 : i32
    return %c0_i32, %c0_i32_0 : i32, i32
  }
  func.func @transform_3(%arg0: i32) -> (i32, i32) {
    %c0_i32 = arith.constant 0 : i32
    %c0_i32_0 = arith.constant 0 : i32
    %c0_i32_1 = arith.constant 0 : i32
    return %c0_i32, %c0_i32_0 : i32, i32
  }
  func.func @transform_4(%arg0: i32) -> (i32, i32) {
    %c0_i32 = arith.constant 0 : i32
    %c0_i32_0 = arith.constant 0 : i32
    %c0_i32_1 = arith.constant 0 : i32
    return %c0_i32, %c0_i32_0 : i32, i32
  }
  func.func @transform_5(%arg0: i32) -> (i32, i32) {
    %c0_i32 = arith.constant 0 : i32
    %c0_i32_0 = arith.constant 0 : i32
    %c0_i32_1 = arith.constant 0 : i32
    return %c0_i32, %c0_i32_0 : i32, i32
  }
  func.func @transform_6(%arg0: i32) -> (i32, i32) {
    %c0_i32 = arith.constant 0 : i32
    %c0_i32_0 = arith.constant 0 : i32
    %c0_i32_1 = arith.constant 0 : i32
    return %c0_i32, %c0_i32_0 : i32, i32
  }
  func.func @transform_7(%arg0: i32) -> (i32, i32) {
    %c0_i32 = arith.constant 0 : i32
    %c0_i32_0 = arith.constant 0 : i32
    %c0_i32_1 = arith.constant 0 : i32
    return %c0_i32, %c0_i32_0 : i32, i32
  }
  func.func @transform_8(%arg0: i32) -> (i32, i32, i32) {
    %c0_i32 = arith.constant 0 : i32
    %c0_i32_0 = arith.constant 0 : i32
    %c0_i32_1 = arith.constant 0 : i32
    return %arg0, %c0_i32, %c0_i32_0 : i32, i32, i32
  }
}

</mosaic_0001>

<bundles_post_ra>
// kernel: spectral_transform_forward.1
= control target key start
LH: loop header
LB: loop body
LE: loop exit
PB: predicated region body
PF: predicated region fallthrough
CT: control target
= control target key end

     0   :  { %s2279_s27 = smov 0   ;;  %s3105_s0 = inlined_call_operand.vmem [shape: f32[2,16,256], index: 0, kind: input, shape index: {}]   ;;  %s3106_s1 = inlined_call_operand.vmem [shape: bf16[8,16], index: 1, kind: input, shape index: {}]   ;;  %s3107_s2 = inlined_call_operand.vmem [shape: f32[8,1], index: 2, kind: input, shape index: {}]   ;;  %s3108_s3 = inlined_call_operand.vmem [shape: bf16[256,512], index: 3, kind: input, shape index: {}]   ;;  %s3109_s4 = inlined_call_operand.vmem [shape: bf16[16,16], index: 4, kind: input, shape index: {}]   ;;  %s3110_s5 = inlined_call_operand.vmem [shape: f32[16,1], index: 5, kind: input, shape index: {}]   ;;  %s3111_s6 = inlined_call_operand.vmem [shape: bf16[512,256], index: 6, kind: input, shape index: {}]   ;;  %s3112_s7 = inlined_call_operand.vmem [shape: bf16[16,8], index: 7, kind: input, shape index: {}]   ;;  %s3113_s8 = inlined_call_operand.vmem [shape: f32[2,16,256], index: 8, kind: output, shape index: {}]  }
   0x1 LB: > { %s1545_s28 = sadd.s32 4294967295, %s2231_s27   ;;  %p1549_p0 = scmp.ge.s32.totalorder %s2231_s27, 1  ;;  %s2231_s27 = sphi %s2279_s27, %s18_s27  }
   0x2   : > { %p262_p1 = scmp.lt.s32.totalorder %s2231_s27, 3 }
   0x4   : > { %p263_p2 = pnand %p1549_p0, %p262_p1 }
   0x5   : > { %p296_p3 = scmp.lt.s32.totalorder (!%p263_p2), %s1545_s28, 1 }
   0x6   : > { %266 = sbr.rel (%p263_p2) target bundleno = 758 (0x2f6), region = 52 }
   0xb   : > { %v308_v0 = vld [vmem:[%s3107_s2] sm:$0xff]  ;;  %v2233_v1 = vmov 0   ;;  %v2114_v3 = vld [vmem:[%s3108_s3 + $0xec] sm:$0xf0]  ;;  %s3115_s28 = smov (!%p296_p3, %s1545_s28), 1  ;;  %v857_v13 = vld [vmem:[%s3110_s5 + $0x8] sm:$0xff] }
   0xc   : > { %2223 = vset.pattern.permute.xlu0 %v2233_v1  ;;  %v1670_v2 = vld [vmem:[%s3108_s3 + $0xe0] sm:$0xf]  ;;  %2224 = vset.pattern.permute.xlu1 %v2233_v1  ;;  %v2146_v6 = vld [vmem:[%s3108_s3 + $0x1ec] sm:$0xf0]  ;;  %v2112_v8 = vld [vmem:[%s3108_s3 + $0xe4] sm:$0xf] }
   0xd   : > { %317 = vperm.xlu0 %2223, %v308_v0   ;;  %v1671_v4 = vor.u32 %v2114_v3, %v1670_v2  ;;  %v1798_v5 = vld [vmem:[%s3108_s3 + $0x1e0] sm:$0xf]  ;;  %v1672_v9 = vld [vmem:[%s3108_s3 + $0xf0] sm:$0xf0]  ;;  %v2144_v10 = vld [vmem:[%s3108_s3 + $0x1e4] sm:$0xf] }
   0xe   : > { %v1799_v7 = vor.u32 %v2146_v6, %v1798_v5  ;;  %s2082_s23 = sshll.u32 %s3115_s28, 5  ;;  %v1800_v11 = vld [vmem:[%s3108_s3 + $0x1f0] sm:$0xf0]  ;;  %v1654_v12 = vld [vmem:[%s3108_s3 + $0xc0] sm:$0xf]  ;;  %vm320_vm0 = vcmask 130048   ;;  %v1675_v25 = vor.u32 %v2112_v8, %v1672_v9 }
   0xf   : > { %746 = vmatpush.bf16.msra.mxu2 %v1671_v4  ;;  %s300_s10 = scalar_lea.vmem %s3105_s0, %s2082_s23  ;;  %v2110_v14 = vld [vmem:[%s3108_s3 + $0xcc] sm:$0xf0]  ;;  %v1782_v15 = vld [vmem:[%s3108_s3 + $0x1c0] sm:$0xf]  ;;  %v1803_v26 = vor.u32 %v2144_v10, %v1800_v11  ;;  %v2108_v27 = vld [vmem:[%s3108_s3 + $0xc4] sm:$0xf]  ;;  %s305_s24 = scalar_lea.vmem %s3113_s8, %s2082_s23 }
  0x10   : > { %759 = vmatpush.bf16.msra.mxu3 %v1799_v7  ;;  %v2142_v16 = vld [vmem:[%s3108_s3 + $0x1cc] sm:$0xf0]  ;;  %v309_v17 = vld [vmem:[%s300_s10] sm:$0xff]  ;;  %v310_v19 = vld [vmem:[%s300_s10 + $0x8] sm:$0xff]  ;;  %v1655_v20 = vor.u32 %v2110_v14, %v1654_v12  ;;  %vm1451_vm7 = vcmask 1043456   ;;  %vm1447_vm8 = vcmask 64512  }
  0x11   : > { %v311_v18 = vld [vmem:[%s300_s10 + $0x10] sm:$0xff]  ;;  %v1783_v21 = vor.u32 %v2142_v16, %v1782_v15  ;;  %v312_v23 = vld [vmem:[%s300_s10 + $0x18] sm:$0xff]  ;;  %v307_v24 = vld [vmem:[%s3106_s1] sm:$0xf] }
  0x12   : > { %v313_v22 = vpack.c.bf16 %v311_v18, %v309_v17  ;;  %v1656_v28 = vld [vmem:[%s3108_s3 + $0xd0] sm:$0xf0]  ;;  %v314_v29 = vpack.c.bf16 %v312_v23, %v310_v19  ;;  %v2140_v30 = vld [vmem:[%s3108_s3 + $0x1c4] sm:$0xf]  ;;  %v1638_v32 = vld [vmem:[%s3108_s3 + $0xa0] sm:$0xf] }
  0x13   : > { %747 = vmatpush.bf16.msra.mxu2 %v1655_v20  ;;  %v1784_v31 = vld [vmem:[%s3108_s3 + $0x1d0] sm:$0xf0]  ;;  %v2106_v33 = vld [vmem:[%s3108_s3 + $0xac] sm:$0xf0]  ;;  %v1766_v34 = vld [vmem:[%s3108_s3 + $0x1a0] sm:$0xf]  ;;  %v1659_v40 = vor.u32 %v2108_v27, %v1656_v28 }
  0x14   : > { %331 = vmatpush.bf16.msra.mxu0 %v313_v22  ;;  %760 = vmatpush.bf16.msra.mxu3 %v1783_v21  ;;  %v2138_v35 = vld [vmem:[%s3108_s3 + $0x1ac] sm:$0xf0]  ;;  %v1639_v36 = vor.u32 %v2106_v33, %v1638_v32  ;;  %v2104_v38 = vld [vmem:[%s3108_s3 + $0xa4] sm:$0xf]  ;;  %v1640_v39 = vld [vmem:[%s3108_s3 + $0xb0] sm:$0xf0]  ;;  %v1787_v41 = vor.u32 %v2140_v30, %v1784_v31 }
  0x15   : > { %344 = vmatpush.bf16.msra.mxu1 %v314_v29  ;;  %871 = vperm.xlu0 %2223, %v857_v13   ;;  %v1767_v37 = vor.u32 %v2138_v35, %v1766_v34  ;;  %v2136_v42 = vld [vmem:[%s3108_s3 + $0x1a4] sm:$0xf]  ;;  %v1622_v43 = vld [vmem:[%s3108_s3 + $0x80] sm:$0xf]  ;;  %v2102_v44 = vld [vmem:[%s3108_s3 + $0x8c] sm:$0xf0]  ;;  %v1643_v53 = vor.u32 %v2104_v38, %v1640_v39 }
  0x16   : > { %v1768_v45 = vld [vmem:[%s3108_s3 + $0x1b0] sm:$0xf0]  ;;  %v1623_v46 = vor.u32 %v2102_v44, %v1622_v43  ;;  %v1750_v47 = vld [vmem:[%s3108_s3 + $0x180] sm:$0xf]  ;;  %v2134_v48 = vld [vmem:[%s3108_s3 + $0x18c] sm:$0xf0] }
  0x17   : > { %1554 = vmatmul.msk.bf16.vlgmr.msra.gmra.mxu0 %vm320_vm0, %v307_v24  ;;  %748 = vmatpush.bf16.msra.mxu2 %v1639_v36  ;;  %v1751_v49 = vor.u32 %v2134_v48, %v1750_v47  ;;  %v1606_v50 = vld [vmem:[%s3108_s3 + $0x60] sm:$0xf]  ;;  %v2098_v51 = vld [vmem:[%s3108_s3 + $0x6c] sm:$0xf0]  ;;  %v1771_v54 = vor.u32 %v2136_v42, %v1768_v45  ;;  %v2100_v55 = vld [vmem:[%s3108_s3 + $0x84] sm:$0xf] }
  0x18   : > { %772 = vmatpush.bf16.msrb.mxu0 %v1675_v25  ;;  %1555 = vmatmul.msk.bf16.vlgmr.msra.gmra.mxu1 %vm320_vm0, %v307_v24  ;;  %v1734_v52 = vld [vmem:[%s3108_s3 + $0x160] sm:$0xf]  ;;  %v2130_v56 = vld [vmem:[%s3108_s3 + $0x16c] sm:$0xf0]  ;;  %v1624_v57 = vld [vmem:[%s3108_s3 + $0x90] sm:$0xf0]  ;;  %v1607_v60 = vor.u32 %v2098_v51, %v1606_v50 }
  0x19   : > { %785 = vmatpush.bf16.msrb.mxu1 %v1803_v26  ;;  %761 = vmatpush.bf16.msra.mxu3 %v1767_v37  ;;  %v2132_v58 = vld [vmem:[%s3108_s3 + $0x184] sm:$0xf]  ;;  %v1752_v59 = vld [vmem:[%s3108_s3 + $0x190] sm:$0xf0]  ;;  %v1735_v61 = vor.u32 %v2130_v56, %v1734_v52  ;;  %v1590_v62 = vld [vmem:[%s3108_s3 + $0x40] sm:$0xf]  ;;  %v1627_v2 = vor.u32 %v2100_v55, %v1624_v57 }
  0x1a   : > { %v2094_v63 = vld [vmem:[%s3108_s3 + $0x4c] sm:$0xf0]  ;;  %v1718_v0 = vld [vmem:[%s3108_s3 + $0x140] sm:$0xf]  ;;  %v1755_v3 = vor.u32 %v2132_v58, %v1752_v59  ;;  %v2096_v4 = vld [vmem:[%s3108_s3 + $0x64] sm:$0xf] }
  0x1b   : > { %749 = vmatpush.bf16.msra.mxu2 %v1623_v46  ;;  %v2126_v1 = vld [vmem:[%s3108_s3 + $0x14c] sm:$0xf0]  ;;  %v1608_v5 = vld [vmem:[%s3108_s3 + $0x70] sm:$0xf0]  ;;  %v2128_v6 = vld [vmem:[%s3108_s3 + $0x164] sm:$0xf]  ;;  %v1591_v8 = vor.u32 %v2094_v63, %v1590_v62 }
  0x1c   : > { %773 = vmatpush.bf16.msrb.mxu0 %v1659_v40  ;;  %v1736_v7 = vld [vmem:[%s3108_s3 + $0x170] sm:$0xf0]  ;;  %v1719_v9 = vor.u32 %v2126_v1, %v1718_v0  ;;  %v1574_v10 = vld [vmem:[%s3108_s3 + $0x20] sm:$0xf]  ;;  %v2090_v11 = vld [vmem:[%s3108_s3 + $0x2c] sm:$0xf0]  ;;  %v1611_v14 = vor.u32 %v2096_v4, %v1608_v5 }
  0x1d   : > { %786 = vmatpush.bf16.msrb.mxu1 %v1787_v41  ;;  %762 = vmatpush.bf16.msra.mxu3 %v1751_v49  ;;  %v1702_v12 = vld [vmem:[%s3108_s3 + $0x120] sm:$0xf]  ;;  %v2122_v13 = vld [vmem:[%s3108_s3 + $0x12c] sm:$0xf0]  ;;  %v1739_v15 = vor.u32 %v2128_v6, %v1736_v7  ;;  %v2092_v16 = vld [vmem:[%s3108_s3 + $0x44] sm:$0xf]  ;;  %v1575_v20 = vor.u32 %v2090_v11, %v1574_v10 }
  0x1e   : > { %v1592_v17 = vld [vmem:[%s3108_s3 + $0x50] sm:$0xf0]  ;;  %v2124_v18 = vld [vmem:[%s3108_s3 + $0x144] sm:$0xf]  ;;  %v1703_v21 = vor.u32 %v2122_v13, %v1702_v12  ;;  %v1558_v22 = vld [vmem:[%s3108_s3] sm:$0xf] }
  0x1f   : > { %750 = vmatpush.bf16.msra.mxu2 %v1607_v60  ;;  %v1720_v19 = vld [vmem:[%s3108_s3 + $0x150] sm:$0xf0]  ;;  %v2086_v23 = vld [vmem:[%s3108_s3 + $0xc] sm:$0xf0]  ;;  %v1686_v24 = vld [vmem:[%s3108_s3 + $0x100] sm:$0xf]  ;;  %v1595_v26 = vor.u32 %v2092_v16, %v1592_v17 }
  0x20   : > { %774 = vmatpush.bf16.msrb.mxu0 %v1643_v53  ;;  %v2118_v25 = vld [vmem:[%s3108_s3 + $0x10c] sm:$0xf0]  ;;  %v1723_v27 = vor.u32 %v2124_v18, %v1720_v19  ;;  %v2088_v28 = vld [vmem:[%s3108_s3 + $0x24] sm:$0xf]  ;;  %v1576_v29 = vld [vmem:[%s3108_s3 + $0x30] sm:$0xf0]  ;;  %v1559_v32 = vor.u32 %v2086_v23, %v1558_v22 }
  0x21   : > { %787 = vmatpush.bf16.msrb.mxu1 %v1771_v54  ;;  %763 = vmatpush.bf16.msra.mxu3 %v1735_v61  ;;  %v2120_v30 = vld [vmem:[%s3108_s3 + $0x124] sm:$0xf]  ;;  %v1704_v31 = vld [vmem:[%s3108_s3 + $0x130] sm:$0xf0]  ;;  %v1687_v33 = vor.u32 %v2118_v25, %v1686_v24  ;;  %v1579_v34 = vor.u32 %v2088_v28, %v1576_v29  ;;  %v1678_v41 = vld [vmem:[%s3108_s3 + $0xe8] sm:$0xf] }
  0x22   : > { %v1707_v35 = vor.u32 %v2120_v30, %v1704_v31  ;;  %v2084_v36 = vld [vmem:[%s3108_s3 + $0x4] sm:$0xf]  ;;  %v1560_v37 = vld [vmem:[%s3108_s3 + $0x10] sm:$0xf0]  ;;  %v2115_v42 = vld [vmem:[%s3108_s3 + $0xf4] sm:$0xf0] }
  0x23   : > { %751 = vmatpush.bf16.msra.mxu2 %v1591_v8  ;;  %v2116_v38 = vld [vmem:[%s3108_s3 + $0x104] sm:$0xf]  ;;  %v1563_v39 = vor.u32 %v2084_v36, %v1560_v37  ;;  %v1688_v40 = vld [vmem:[%s3108_s3 + $0x110] sm:$0xf0]  ;;  %v1679_v44 = vor.u32 %v2115_v42, %v1678_v41  ;;  %v1806_v45 = vld [vmem:[%s3108_s3 + $0x1e8] sm:$0xf] }
  0x24   : > { %775 = vmatpush.bf16.msrb.mxu0 %v1627_v2  ;;  %v1691_v43 = vor.u32 %v2116_v38, %v1688_v40  ;;  %v2147_v46 = vld [vmem:[%s3108_s3 + $0x1f4] sm:$0xf0]  ;;  %v2113_v47 = vld [vmem:[%s3108_s3 + $0xec] sm:$0xf]  ;;  %v1680_v49 = vld [vmem:[%s3108_s3 + $0xf8] sm:$0xf0] }
  0x25   : > { %788 = vmatpush.bf16.msrb.mxu1 %v1755_v3  ;;  %764 = vmatpush.bf16.msra.mxu3 %v1719_v9  ;;  %v1807_v48 = vor.u32 %v2147_v46, %v1806_v45  ;;  %v2145_v50 = vld [vmem:[%s3108_s3 + $0x1ec] sm:$0xf]  ;;  %v1808_v51 = vld [vmem:[%s3108_s3 + $0x1f8] sm:$0xf0]  ;;  %v1683_v52 = vor.u32 %v2113_v47, %v1680_v49  ;;  %v1662_v54 = vld [vmem:[%s3108_s3 + $0xc8] sm:$0xf] }
  0x26   : > { %v1811_v53 = vor.u32 %v2145_v50, %v1808_v51  ;;  %v2111_v55 = vld [vmem:[%s3108_s3 + $0xd4] sm:$0xf0]  ;;  %v1790_v56 = vld [vmem:[%s3108_s3 + $0x1c8] sm:$0xf]  ;;  %v2109_v59 = vld [vmem:[%s3108_s3 + $0xcc] sm:$0xf] }
  0x27   : > { %752 = vmatpush.bf16.msra.mxu2 %v1575_v20  ;;  %v1663_v57 = vor.u32 %v2111_v55, %v1662_v54  ;;  %v2143_v58 = vld [vmem:[%s3108_s3 + $0x1d4] sm:$0xf0]  ;;  %v1664_v60 = vld [vmem:[%s3108_s3 + $0xd8] sm:$0xf0]  ;;  %v2141_v63 = vld [vmem:[%s3108_s3 + $0x1cc] sm:$0xf] }
  0x28   : > { %776 = vmatpush.bf16.msrb.mxu0 %v1611_v14  ;;  %v1791_v61 = vor.u32 %v2143_v58, %v1790_v56  ;;  %v1667_v62 = vor.u32 %v2109_v59, %v1664_v60  ;;  %v1792_v0 = vld [vmem:[%s3108_s3 + $0x1d8] sm:$0xf0]  ;;  %v1646_v2 = vld [vmem:[%s3108_s3 + $0xa8] sm:$0xf]  ;;  %v2107_v3 = vld [vmem:[%s3108_s3 + $0xb4] sm:$0xf0] }
  0x29   : > { %789 = vmatpush.bf16.msrb.mxu1 %v1739_v15  ;;  %765 = vmatpush.bf16.msra.mxu3 %v1703_v21  ;;  %v1795_v1 = vor.u32 %v2141_v63, %v1792_v0  ;;  %v1774_v4 = vld [vmem:[%s3108_s3 + $0x1a8] sm:$0xf]  ;;  %v1647_v5 = vor.u32 %v2107_v3, %v1646_v2  ;;  %v2139_v6 = vld [vmem:[%s3108_s3 + $0x1b4] sm:$0xf0]  ;;  %v2105_v7 = vld [vmem:[%s3108_s3 + $0xac] sm:$0xf] }
  0x2a   : > { %v1648_v8 = vld [vmem:[%s3108_s3 + $0xb8] sm:$0xf0]  ;;  %v1775_v9 = vor.u32 %v2139_v6, %v1774_v4  ;;  %v2137_v11 = vld [vmem:[%s3108_s3 + $0x1ac] sm:$0xf]  ;;  %v1630_v14 = vld [vmem:[%s3108_s3 + $0x88] sm:$0xf] }
  0x2b   : > { %753 = vmatpush.bf16.msra.mxu2 %v1559_v32  ;;  %v1651_v10 = vor.u32 %v2105_v7, %v1648_v8  ;;  %v1776_v12 = vld [vmem:[%s3108_s3 + $0x1b8] sm:$0xf0]  ;;  %v2103_v15 = vld [vmem:[%s3108_s3 + $0x94] sm:$0xf0]  ;;  %v1758_v16 = vld [vmem:[%s3108_s3 + $0x188] sm:$0xf] }
  0x2c   : > { %777 = vmatpush.bf16.msrb.mxu0 %v1595_v26  ;;  %v1779_v13 = vor.u32 %v2137_v11, %v1776_v12  ;;  %v1631_v17 = vor.u32 %v2103_v15, %v1630_v14  ;;  %v2135_v18 = vld [vmem:[%s3108_s3 + $0x194] sm:$0xf0]  ;;  %v2101_v19 = vld [vmem:[%s3108_s3 + $0x8c] sm:$0xf]  ;;  %v1632_v20 = vld [vmem:[%s3108_s3 + $0x98] sm:$0xf0] }
  0x2d   : > { %790 = vmatpush.bf16.msrb.mxu1 %v1723_v27  ;;  %766 = vmatpush.bf16.msra.mxu3 %v1687_v33  ;;  %v1759_v21 = vor.u32 %v2135_v18, %v1758_v16  ;;  %v1635_v22 = vor.u32 %v2101_v19, %v1632_v20  ;;  %v2133_v23 = vld [vmem:[%s3108_s3 + $0x18c] sm:$0xf]  ;;  %v1760_v24 = vld [vmem:[%s3108_s3 + $0x198] sm:$0xf0]  ;;  %v1614_v26 = vld [vmem:[%s3108_s3 + $0x68] sm:$0xf] }
  0x2e   : > { %v1763_v25 = vor.u32 %v2133_v23, %v1760_v24  ;;  %v2099_v27 = vld [vmem:[%s3108_s3 + $0x74] sm:$0xf0]  ;;  %v1742_v28 = vld [vmem:[%s3108_s3 + $0x168] sm:$0xf]  ;;  %v2097_v31 = vld [vmem:[%s3108_s3 + $0x6c] sm:$0xf] }
  0x2f   : > { %798 = vmatpush.bf16.msrb.mxu2 %v1679_v44  ;;  %v1615_v29 = vor.u32 %v2099_v27, %v1614_v26  ;;  %v2131_v30 = vld [vmem:[%s3108_s3 + $0x174] sm:$0xf0]  ;;  %v1616_v32 = vld [vmem:[%s3108_s3 + $0x78] sm:$0xf0]  ;;  %v1598_v37 = vld [vmem:[%s3108_s3 + $0x48] sm:$0xf] }
  0x30   : > { %778 = vmatpush.bf16.msrb.mxu0 %v1579_v34  ;;  %v1743_v33 = vor.u32 %v2131_v30, %v1742_v28  ;;  %v1619_v34 = vor.u32 %v2097_v31, %v1616_v32  ;;  %v1744_v36 = vld [vmem:[%s3108_s3 + $0x178] sm:$0xf0]  ;;  %v1726_v40 = vld [vmem:[%s3108_s3 + $0x148] sm:$0xf]  ;;  %v2127_v41 = vld [vmem:[%s3108_s3 + $0x154] sm:$0xf0] }
  0x31   : > { %791 = vmatpush.bf16.msrb.mxu1 %v1707_v35  ;;  %811 = vmatpush.bf16.msrb.mxu3 %v1807_v48  ;;  %v2129_v35 = vld [vmem:[%s3108_s3 + $0x16c] sm:$0xf]  ;;  %v1600_v45 = vld [vmem:[%s3108_s3 + $0x58] sm:$0xf0]  ;;  %v1582_v49 = vld [vmem:[%s3108_s3 + $0x28] sm:$0xf] }
  0x32   : > { %v1747_v38 = vor.u32 %v2129_v35, %v1744_v36  ;;  %v2093_v44 = vld [vmem:[%s3108_s3 + $0x4c] sm:$0xf]  ;;  %v1728_v48 = vld [vmem:[%s3108_s3 + $0x158] sm:$0xf0]  ;;  %v2091_v50 = vld [vmem:[%s3108_s3 + $0x34] sm:$0xf0] }
  0x33   : > { %799 = vmatpush.bf16.msrb.mxu2 %v1663_v57  ;;  %v2125_v46 = vld [vmem:[%s3108_s3 + $0x14c] sm:$0xf]  ;;  %v1603_v47 = vor.u32 %v2093_v44, %v1600_v45  ;;  %v1583_v55 = vor.u32 %v2091_v50, %v1582_v49  ;;  %v1584_v56 = vld [vmem:[%s3108_s3 + $0x38] sm:$0xf0]  ;;  %v1694_v63 = vld [vmem:[%s3108_s3 + $0x108] sm:$0xf] }
  0x34   : > { %779 = vmatpush.bf16.msrb.mxu0 %v1563_v39  ;;  %v2095_v39 = vld [vmem:[%s3108_s3 + $0x54] sm:$0xf0]  ;;  %v1731_v51 = vor.u32 %v2125_v46, %v1728_v48  ;;  %v2089_v54 = vld [vmem:[%s3108_s3 + $0x2c] sm:$0xf]  ;;  %v1712_v58 = vld [vmem:[%s3108_s3 + $0x138] sm:$0xf0] }
  0x35   : > { %792 = vmatpush.bf16.msrb.mxu1 %v1691_v43  ;;  %812 = vmatpush.bf16.msrb.mxu3 %v1791_v61  ;;  %v1599_v42 = vor.u32 %v2095_v39, %v1598_v37  ;;  %v1727_v43 = vor.u32 %v2127_v41, %v1726_v40  ;;  %v2121_v57 = vld [vmem:[%s3108_s3 + $0x12c] sm:$0xf]  ;;  %v1587_v60 = vor.u32 %v2089_v54, %v1584_v56  ;;  %v1566_v61 = vld [vmem:[%s3108_s3 + $0x8] sm:$0xf]  ;;  %v1568_v3 = vld [vmem:[%s3108_s3 + $0x18] sm:$0xf0] }
  0x36   : > { %v1715_v0 = vor.u32 %v2121_v57, %v1712_v58  ;;  %v2085_v2 = vld [vmem:[%s3108_s3 + $0xc] sm:$0xf]  ;;  %v856_v23 = vld [vmem:[%s3110_s5] sm:$0xff]  ;;  %v1876_v24 = vld [vmem:[%s3111_s6 + $0x70] sm:$0xf] }
  0x37   : > { %800 = vmatpush.bf16.msrb.mxu2 %v1647_v5  ;;  %v2117_v4 = vld [vmem:[%s3108_s3 + $0x10c] sm:$0xf]  ;;  %v1696_v5 = vld [vmem:[%s3108_s3 + $0x118] sm:$0xf0]  ;;  %v1571_v8 = vor.u32 %v2085_v2, %v1568_v3  ;;  %866 = vperm.xlu1 %2224, %v856_v23   ;;  %v1940_v28 = vld [vmem:[%s3111_s6 + $0xf0] sm:$0xf] }
  0x38   : > { %824 = vmatpush.bf16.msra.mxu0 %v1683_v52  ;;  %v1710_v52 = vld [vmem:[%s3108_s3 + $0x128] sm:$0xf]  ;;  %v1868_v30 = vld [vmem:[%s3111_s6 + $0x60] sm:$0xf]  ;;  %v2160_v39 = vld [vmem:[%s3111_s6 + $0x54] sm:$0xf0] }
  0x39   : > { %837 = vmatpush.bf16.msra.mxu1 %v1811_v53  ;;  %813 = vmatpush.bf16.msrb.mxu3 %v1775_v9  ;;  %v2123_v53 = vld [vmem:[%s3108_s3 + $0x134] sm:$0xf0]  ;;  %v1699_v9 = vor.u32 %v2117_v4, %v1696_v5  ;;  %v2178_v35 = vld [vmem:[%s3111_s6 + $0xe4] sm:$0xf0]  ;;  %v1924_v40 = vld [vmem:[%s3111_s6 + $0xd0] sm:$0xf] }
  0x3a   : > { %v1711_v59 = vor.u32 %v2123_v53, %v1710_v52  ;;  %v2176_v41 = vld [vmem:[%s3111_s6 + $0xd4] sm:$0xf0]  ;;  %v1852_v46 = vld [vmem:[%s3111_s6 + $0x40] sm:$0xf]  ;;  %v2174_v50 = vld [vmem:[%s3111_s6 + $0xc4] sm:$0xf0] }
  0x3b   : > { %801 = vmatpush.bf16.msrb.mxu2 %v1631_v17  ;;  %v1925_v45 = vor.u32 %v2176_v41, %v1924_v40  ;;  %v1916_v49 = vld [vmem:[%s3111_s6 + $0xc0] sm:$0xf]  ;;  %v1844_v54 = vld [vmem:[%s3111_s6 + $0x30] sm:$0xf]  ;;  %v2172_v57 = vld [vmem:[%s3111_s6 + $0xb4] sm:$0xf0] }
  0x3c   : > { %825 = vmatpush.bf16.msra.mxu0 %v1667_v62  ;;  %v2087_v62 = vld [vmem:[%s3108_s3 + $0x14] sm:$0xf0]  ;;  %v1917_v53 = vor.u32 %v2174_v50, %v1916_v49  ;;  %v1908_v56 = vld [vmem:[%s3111_s6 + $0xb0] sm:$0xf]  ;;  %v1900_v3 = vld [vmem:[%s3111_s6 + $0xa0] sm:$0xf] }
  0x3d   : > { %838 = vmatpush.bf16.msra.mxu1 %v1795_v1  ;;  %814 = vmatpush.bf16.msrb.mxu3 %v1759_v21  ;;  %v2119_v1 = vld [vmem:[%s3108_s3 + $0x114] sm:$0xf0]  ;;  %v1567_v6 = vor.u32 %v2087_v62, %v1566_v61  ;;  %v2068_v61 = vld [vmem:[%s3111_s6 + $0x1f0] sm:$0xf]  ;;  %v1909_v62 = vor.u32 %v2172_v57, %v1908_v56  ;;  %v2170_v4 = vld [vmem:[%s3111_s6 + $0xa4] sm:$0xf0] }
  0x3e   : > { %v1695_v7 = vor.u32 %v2119_v1, %v1694_v63  ;;  %v1836_v63 = vld [vmem:[%s3111_s6 + $0x20] sm:$0xf]  ;;  %v2212_v2 = vld [vmem:[%s3111_s6 + $0x1f4] sm:$0xf0]  ;;  %v2206_v40 = vld [vmem:[%s3111_s6 + $0x1c4] sm:$0xf0] }
  0x3f   : > { %802 = vmatpush.bf16.msrb.mxu2 %v1615_v29  ;;  %v2180_v29 = vld [vmem:[%s3111_s6 + $0xf4] sm:$0xf0]  ;;  %v1980_v50 = vld [vmem:[%s3111_s6 + $0x140] sm:$0xf] }
  0x40   : > { %826 = vmatpush.bf16.msra.mxu0 %v1651_v10  ;;  %v1941_v32 = vor.u32 %v2180_v29, %v1940_v28  ;;  %v2196_v23 = vld [vmem:[%s3111_s6 + $0x174] sm:$0xf0]  ;;  %v1820_v57 = vld [vmem:[%s3111_s6] sm:$0xf] }
  0x41   : > { %839 = vmatpush.bf16.msra.mxu1 %v1779_v13  ;;  %815 = vmatpush.bf16.msrb.mxu3 %v1743_v33  ;;  %v2162_v33 = vld [vmem:[%s3111_s6 + $0x64] sm:$0xf0] }
  0x42   : > { %v1869_v36 = vor.u32 %v2162_v33, %v1868_v30 }
  0x43   : > { %803 = vmatpush.bf16.msrb.mxu2 %v1599_v42 }
  0x44   : > { %827 = vmatpush.bf16.msra.mxu0 %v1635_v22 }
  0x45   : > { %840 = vmatpush.bf16.msra.mxu1 %v1763_v25  ;;  %816 = vmatpush.bf16.msrb.mxu3 %v1727_v43  ;;  %v2164_v25 = vld [vmem:[%s3111_s6 + $0x74] sm:$0xf0] }
  0x46   : > { %v1877_v27 = vor.u32 %v2164_v25, %v1876_v24 }
  0x47   : > { %804 = vmatpush.bf16.msrb.mxu2 %v1583_v55  ;;  %v2156_v55 = vld [vmem:[%s3111_s6 + $0x34] sm:$0xf0] }
  0x48   : > { %828 = vmatpush.bf16.msra.mxu0 %v1619_v34  ;;  %v1932_v34 = vld [vmem:[%s3111_s6 + $0xe0] sm:$0xf] }
  0x49   : > { %841 = vmatpush.bf16.msra.mxu1 %v1747_v38  ;;  %817 = vmatpush.bf16.msrb.mxu3 %v1711_v59  ;;  %v1933_v37 = vor.u32 %v2178_v35, %v1932_v34  ;;  %v1860_v38 = vld [vmem:[%s3111_s6 + $0x50] sm:$0xf]  ;;  %v1845_v59 = vor.u32 %v2156_v55, %v1844_v54  ;;  %v2188_v55 = vld [vmem:[%s3111_s6 + $0x134] sm:$0xf0] }
  0x4a   : > { %v1861_v43 = vor.u32 %v2160_v39, %v1860_v38  ;;  %v2044_v39 = vld [vmem:[%s3111_s6 + $0x1c0] sm:$0xf]  ;;  %v1972_v54 = vld [vmem:[%s3111_s6 + $0x130] sm:$0xf] }
  0x4b   : > { %805 = vmatpush.bf16.msrb.mxu2 %v1567_v6  ;;  %v1973_v56 = vor.u32 %v2188_v55, %v1972_v54  ;;  %v2155_v55 = vld [vmem:[%s3111_s6 + $0x34] sm:$0xf] }
  0x4c   : > { %829 = vmatpush.bf16.msra.mxu0 %v1603_v47  ;;  %v2158_v47 = vld [vmem:[%s3111_s6 + $0x44] sm:$0xf0] }
  0x4d   : > { %842 = vmatpush.bf16.msra.mxu1 %v1731_v51  ;;  %818 = vmatpush.bf16.msrb.mxu3 %v1695_v7  ;;  %v1853_v52 = vor.u32 %v2158_v47, %v1852_v46  ;;  %v2045_v46 = vor.u32 %v2206_v40, %v2044_v39  ;;  %v2036_v47 = vld [vmem:[%s3111_s6 + $0x1b0] sm:$0xf]  ;;  %v2211_v39 = vld [vmem:[%s3111_s6 + $0x1f4] sm:$0xf]  ;;  %v2070_v40 = vld [vmem:[%s3111_s6 + $0x1f8] sm:$0xf0] }
  0x50   : > { %830 = vmatpush.bf16.msra.mxu0 %v1587_v60 }
  0x51   : > { %843 = vmatpush.bf16.msra.mxu1 %v1715_v0  ;;  %v2154_v0 = vld [vmem:[%s3111_s6 + $0x24] sm:$0xf0] }
  0x54   : > { %831 = vmatpush.bf16.msra.mxu0 %v1571_v8  ;;  %v1837_v8 = vor.u32 %v2154_v0, %v1836_v63  ;;  %v2186_v63 = vld [vmem:[%s3111_s6 + $0x124] sm:$0xf0] }
  0x55   : > { %844 = vmatpush.bf16.msra.mxu1 %v1699_v9  ;;  %v2069_v9 = vor.u32 %v2212_v2, %v2068_v61  ;;  %v2166_v61 = vld [vmem:[%s3111_s6 + $0x84] sm:$0xf0]  ;;  %v2028_v2 = vld [vmem:[%s3111_s6 + $0x1a0] sm:$0xf] }
  0x7f   : > { %v318_v10 = vpop.permute.xlu0 %317 }
  0x94   : > { %v333_v11 = vpop.f32.mrf.mxu0 }
  0x95   : > { %v334_v12 = vadd.f32 %v333_v11, %v318_v10  ;;  %v346_v13 = vpop.f32.mrf.mxu1  ;;  %v1901_v11 = vor.u32 %v2170_v4, %v1900_v3  ;;  %v2202_v3 = vld [vmem:[%s3111_s6 + $0x1a4] sm:$0xf0]  ;;  %v2163_v4 = vld [vmem:[%s3111_s6 + $0x74] sm:$0xf] }
  0x96   : > { %v347_v14 = vadd.f32 %v346_v13, %v318_v10  ;;  %v2060_v10 = vld [vmem:[%s3111_s6 + $0x1e0] sm:$0xf]  ;;  %v2152_v13 = vld [vmem:[%s3111_s6 + $0x14] sm:$0xf0] }
  0x97   : > { %vm350_vm1 = vcmp.gt.f32.partialorder %v334_v12, 0.0  ;;  %v352_v15 = vmul.f32 0.01, %v334_v12 }
  0x98   : > { %vm351_vm2 = vcmp.gt.f32.partialorder %v347_v14, 0.0  ;;  %v353_v16 = vmul.f32 0.01, %v347_v14 }
  0x99   : > { %v2690_v17 = vsel %vm350_vm1, %v334_v12, %v352_v15  ;;  %v1828_v12 = vld [vmem:[%s3111_s6 + $0x10] sm:$0xf]  ;;  %v2210_v15 = vld [vmem:[%s3111_s6 + $0x1e4] sm:$0xf0] }
  0x9a   : > { %v360_v18 = vpack.c.bf16 %v2690_v17, %v2690_v17  ;;  %v2694_v19 = vsel %vm351_vm2, %v347_v14, %v353_v16  ;;  %v1892_v16 = vld [vmem:[%s3111_s6 + $0x90] sm:$0xf]  ;;  %v1829_v24 = vor.u32 %v2152_v13, %v1828_v12  ;;  %v2184_v12 = vld [vmem:[%s3111_s6 + $0x114] sm:$0xf0] }
  0x9b   : > { %v361_v20 = vpack.c.bf16 %v2694_v19, %v2694_v19  ;;  %v2020_v13 = vld [vmem:[%s3111_s6 + $0x190] sm:$0xf] }
  0x9c   : > { %v335_v21 = vpop.f32.mrf.mxu0  ;;  %754 = vmatmul.bf16.vlgmr.msra.gmra.mxu2 %v360_v18  ;;  %780 = vmatmul.bf16.vlgmr.msrb.gmra.mxu0 %v360_v18 }
  0x9d   : > { %v348_v22 = vpop.f32.mrf.mxu1  ;;  %767 = vmatmul.bf16.vlgmr.msra.gmra.mxu3 %v361_v20  ;;  %793 = vmatmul.bf16.vlgmr.msrb.gmra.mxu1 %v361_v20 }
  0x9e   : > { %1326 = vmatpush.bf16.msrb.mxu0 %v1877_v27  ;;  %1339 = vmatpush.bf16.msrb.mxu1 %v1941_v32  ;;  %v2004_v22 = vld [vmem:[%s3111_s6 + $0x170] sm:$0xf]  ;;  %v2208_v32 = vld [vmem:[%s3111_s6 + $0x1d4] sm:$0xf0] }
  0x9f   : > { %v2005_v34 = vor.u32 %v2196_v23, %v2004_v22  ;;  %v2177_v22 = vld [vmem:[%s3111_s6 + $0xe4] sm:$0xf]  ;;  %v1934_v23 = vld [vmem:[%s3111_s6 + $0xe8] sm:$0xf0] }
  0xa2   : > { %1327 = vmatpush.bf16.msrb.mxu0 %v1869_v36  ;;  %1340 = vmatpush.bf16.msrb.mxu1 %v1933_v37  ;;  %v1996_v36 = vld [vmem:[%s3111_s6 + $0x160] sm:$0xf]  ;;  %v2194_v37 = vld [vmem:[%s3111_s6 + $0x164] sm:$0xf0] }
  0xa3   : > { %v1997_v41 = vor.u32 %v2194_v37, %v1996_v36  ;;  %v2195_v36 = vld [vmem:[%s3111_s6 + $0x174] sm:$0xf] }
  0xa6   : > { %1328 = vmatpush.bf16.msrb.mxu0 %v1861_v43  ;;  %1341 = vmatpush.bf16.msrb.mxu1 %v1925_v45  ;;  %v1988_v43 = vld [vmem:[%s3111_s6 + $0x150] sm:$0xf] }
  0xaa   : > { %1329 = vmatpush.bf16.msrb.mxu0 %v1853_v52  ;;  %1342 = vmatpush.bf16.msrb.mxu1 %v1917_v53 }
  0xac   : > { %806 = vmatmul.bf16.vlgmr.msrb.gmra.mxu2 %v360_v18  ;;  %832 = vmatmul.bf16.vlgmr.msra.gmra.mxu0 %v360_v18  ;;  %v2168_v18 = vld [vmem:[%s3111_s6 + $0x94] sm:$0xf0] }
  0xad   : > { %819 = vmatmul.bf16.vlgmr.msrb.gmra.mxu3 %v361_v20  ;;  %845 = vmatmul.bf16.vlgmr.msra.gmra.mxu1 %v361_v20  ;;  %v2148_v20 = vld [vmem:[%s3109_s4] sm:$0xff]  ;;  %v1893_v27 = vor.u32 %v2168_v18, %v1892_v16  ;;  %v1870_v18 = vld [vmem:[%s3111_s6 + $0x68] sm:$0xf0] }
  0xae   : > { %1330 = vmatpush.bf16.msrb.mxu0 %v1845_v59  ;;  %1343 = vmatpush.bf16.msrb.mxu1 %v1909_v62  ;;  %v1884_v59 = vld [vmem:[%s3111_s6 + $0x80] sm:$0xf]  ;;  %v2161_v16 = vld [vmem:[%s3111_s6 + $0x64] sm:$0xf] }
  0xaf   : > { %v1964_v62 = vld [vmem:[%s3111_s6 + $0x120] sm:$0xf]  ;;  %v1885_v0 = vor.u32 %v2166_v61, %v1884_v59  ;;  %v1910_v59 = vld [vmem:[%s3111_s6 + $0xb8] sm:$0xf0] }
  0xb0   : > { %v1990_v61 = vld [vmem:[%s3111_s6 + $0x158] sm:$0xf0] }
  0xb2   : > { %1331 = vmatpush.bf16.msrb.mxu0 %v1837_v8  ;;  %1344 = vmatpush.bf16.msrb.mxu1 %v1901_v11  ;;  %v1942_v8 = vld [vmem:[%s3111_s6 + $0xf8] sm:$0xf0]  ;;  %v1956_v11 = vld [vmem:[%s3111_s6 + $0x110] sm:$0xf] }
  0xb6   : > { %1332 = vmatpush.bf16.msrb.mxu0 %v1829_v24  ;;  %1345 = vmatpush.bf16.msrb.mxu1 %v1893_v27  ;;  %v1937_v24 = vor.u32 %v2177_v22, %v1934_v23  ;;  %v2012_v27 = vld [vmem:[%s3111_s6 + $0x180] sm:$0xf]  ;;  %v2187_v22 = vld [vmem:[%s3111_s6 + $0x134] sm:$0xf]  ;;  %v1974_v23 = vld [vmem:[%s3111_s6 + $0x138] sm:$0xf0] }
  0xba   : > { %1346 = vmatpush.bf16.msrb.mxu1 %v1885_v0  ;;  %v2207_v0 = vld [vmem:[%s3111_s6 + $0x1d4] sm:$0xf] }
 0x119   : > { %v781_v26 = vpop.f32.mrf.mxu0 }
 0x11a   : > { %v794_v31 = vpop.f32.mrf.mxu1 }
 0x11b   : > { %v795_v6 = vadd.f32 %v794_v31, %v781_v26  ;;  %v2061_v26 = vor.u32 %v2210_v15, %v2060_v10  ;;  %v2052_v31 = vld [vmem:[%s3111_s6 + $0x1d0] sm:$0xf]  ;;  %v2200_v15 = vld [vmem:[%s3111_s6 + $0x194] sm:$0xf0] }
 0x11c   : > { %v2053_v38 = vor.u32 %v2208_v32, %v2052_v31  ;;  %v1862_v31 = vld [vmem:[%s3111_s6 + $0x58] sm:$0xf0] }
 0x11f   : > { %v755_v42 = vpop.f32.mrf.mxu2 }
 0x120   : > { %v768_v44 = vpop.f32.mrf.mxu3 }
 0x121   : > { %v783_v48 = vpop.f32.mrf.mxu0  ;;  %v769_v28 = vadd.f32 %v768_v44, %v755_v42  ;;  %v2192_v44 = vld [vmem:[%s3111_s6 + $0x154] sm:$0xf0] }
 0x122   : > { %v796_v51 = vpop.f32.mrf.mxu1  ;;  %v2204_v48 = vld [vmem:[%s3111_s6 + $0x1b4] sm:$0xf0]  ;;  %v1989_v49 = vor.u32 %v2192_v44, %v1988_v43  ;;  %v2157_v43 = vld [vmem:[%s3111_s6 + $0x44] sm:$0xf]  ;;  %v1854_v44 = vld [vmem:[%s3111_s6 + $0x48] sm:$0xf0] }
 0x123   : > { %v2190_v51 = vld [vmem:[%s3111_s6 + $0x144] sm:$0xf0]  ;;  %v2037_v52 = vor.u32 %v2204_v48, %v2036_v47  ;;  %v1918_v47 = vld [vmem:[%s3111_s6 + $0xc8] sm:$0xf0]  ;;  %v2193_v48 = vld [vmem:[%s3111_s6 + $0x164] sm:$0xf] }
 0x124   : > { %v1981_v53 = vor.u32 %v2190_v51, %v1980_v50 }
 0x127   : > { %v757_v58 = vpop.f32.mrf.mxu2 }
 0x128   : > { %v770_v60 = vpop.f32.mrf.mxu3  ;;  %v2150_v58 = vld [vmem:[%s3111_s6 + $0x4] sm:$0xf0] }
 0x129   : > { %v833_v1 = vpop.f32.mrf.mxu0  ;;  %v1821_v60 = vor.u32 %v2150_v58, %v1820_v57  ;;  %v2171_v57 = vld [vmem:[%s3111_s6 + $0xb4] sm:$0xf] }
 0x12a   : > { %v846_v5 = vpop.f32.mrf.mxu1 }
 0x12b   : > { %v847_v7 = vadd.f32 %v846_v5, %v833_v1  ;;  %v1965_v1 = vor.u32 %v2186_v63, %v1964_v62  ;;  %1333 = vmatpush.bf16.msrb.mxu0 %v1821_v60  ;;  %v2029_v5 = vor.u32 %v2202_v3, %v2028_v2  ;;  %v2191_v60 = vld [vmem:[%s3111_s6 + $0x154] sm:$0xf]  ;;  %v1913_v62 = vor.u32 %v2171_v57, %v1910_v59  ;;  %v2153_v3 = vld [vmem:[%s3111_s6 + $0x24] sm:$0xf] }
 0x12c   : > { %v1993_v63 = vor.u32 %v2191_v60, %v1990_v61  ;;  %v872_v61 = vpop.permute.xlu0 %871 }
 0x12d   : > { %v863_v14 = vpack.c.bf16 %v847_v7, %v795_v6  ;;  %v1878_v6 = vld [vmem:[%s3111_s6 + $0x78] sm:$0xf0]  ;;  %v2179_v7 = vld [vmem:[%s3111_s6 + $0xf4] sm:$0xf] }
 0x12e   : > { %v1945_v10 = vor.u32 %v2179_v7, %v1942_v8  ;;  %v1902_v7 = vld [vmem:[%s3111_s6 + $0xa8] sm:$0xf0]  ;;  %v2189_v8 = vld [vmem:[%s3111_s6 + $0x144] sm:$0xf] }
 0x12f   : > { %903 = vmatpush.bf16.msra.mxu3 %v863_v14  ;;  %v807_v21 = vpop.f32.mrf.mxu2  ;;  %v1957_v14 = vor.u32 %v2184_v12, %v1956_v11  ;;  %v2205_v12 = vld [vmem:[%s3111_s6 + $0x1c4] sm:$0xf] }
 0x130   : > { %v820_v25 = vpop.f32.mrf.mxu3  ;;  %1391 = vmatpush.bf16.msra.mxu1 %v1945_v10 }
 0x131   : > { %v821_v29 = vadd.f32 %v820_v25, %v807_v21  ;;  %v835_v30 = vpop.f32.mrf.mxu0  ;;  %v1873_v21 = vor.u32 %v2161_v16, %v1870_v18  ;;  %v1948_v25 = vld [vmem:[%s3111_s6 + $0x100] sm:$0xf]  ;;  %v1830_v16 = vld [vmem:[%s3111_s6 + $0x18] sm:$0xf0]  ;;  %v2167_v18 = vld [vmem:[%s3111_s6 + $0x94] sm:$0xf] }
 0x132   : > { %v848_v33 = vpop.f32.mrf.mxu1  ;;  %1817 = vmatmul.msk.bf16.vlgmr.msra.gmra.mxu3 %vm320_vm0, %v2148_v20  ;;  %v2159_v30 = vld [vmem:[%s3111_s6 + $0x54] sm:$0xf] }
 0x133   : > { %1365 = vmatpush.bf16.msrb.mxu3 %v2069_v9  ;;  %v862_v35 = vpack.c.bf16 %v821_v29, %v769_v28  ;;  %v1881_v9 = vor.u32 %v2163_v4, %v1878_v6  ;;  %v2198_v29 = vld [vmem:[%s3111_s6 + $0x184] sm:$0xf0]  ;;  %v1865_v33 = vor.u32 %v2159_v30, %v1862_v31  ;;  %v1838_v4 = vld [vmem:[%s3111_s6 + $0x28] sm:$0xf0]  ;;  %v2165_v31 = vld [vmem:[%s3111_s6 + $0x84] sm:$0xf] }
 0x134   : > { %1392 = vmatpush.bf16.msra.mxu1 %v1937_v24  ;;  %v2013_v32 = vor.u32 %v2198_v29, %v2012_v27  ;;  %v1841_v6 = vor.u32 %v2153_v3, %v1838_v4  ;;  %v2038_v27 = vld [vmem:[%s3111_s6 + $0x1b8] sm:$0xf0]  ;;  %v1822_v30 = vld [vmem:[%s3111_s6 + $0x8] sm:$0xf0] }
 0x135   : > { %889 = vmatpush.bf16.msra.mxu2 %v862_v35  ;;  %1378 = vmatpush.bf16.msra.mxu0 %v1881_v9  ;;  %v1926_v35 = vld [vmem:[%s3111_s6 + $0xd8] sm:$0xf0]  ;;  %v1982_v9 = vld [vmem:[%s3111_s6 + $0x148] sm:$0xf0] }
 0x136   : > { %v1985_v11 = vor.u32 %v2189_v8, %v1982_v9 }
 0x137   : > { %1366 = vmatpush.bf16.msrb.mxu3 %v2061_v26  ;;  %v809_v42 = vpop.f32.mrf.mxu2  ;;  %v2182_v26 = vld [vmem:[%s3111_s6 + $0x104] sm:$0xf0] }
 0x138   : > { %v822_v45 = vpop.f32.mrf.mxu3  ;;  %1816 = vmatmul.msk.bf16.vlgmr.msra.gmra.mxu2 %vm320_vm0, %v2148_v20  ;;  %v2021_v20 = vor.u32 %v2200_v15, %v2020_v13  ;;  %v1949_v28 = vor.u32 %v2182_v26, %v1948_v25  ;;  %v2073_v42 = vor.u32 %v2211_v39, %v2070_v40  ;;  %v2046_v13 = vld [vmem:[%s3111_s6 + $0x1c8] sm:$0xf0]  ;;  %v2151_v15 = vld [vmem:[%s3111_s6 + $0x14] sm:$0xf]  ;;  %v1977_v25 = vor.u32 %v2187_v22, %v1974_v23 }
 0x139   : > { %1352 = vmatpush.bf16.msrb.mxu2 %v2005_v34  ;;  %1379 = vmatpush.bf16.msra.mxu0 %v1873_v21  ;;  %v2175_v34 = vld [vmem:[%s3111_s6 + $0xd4] sm:$0xf]  ;;  %v2173_v45 = vld [vmem:[%s3111_s6 + $0xc4] sm:$0xf]  ;;  %v1894_v21 = vld [vmem:[%s3111_s6 + $0x98] sm:$0xf0] }
 0x13a   : > { %v1929_v37 = vor.u32 %v2175_v34, %v1926_v35  ;;  %v1921_v50 = vor.u32 %v2173_v45, %v1918_v47  ;;  %v1897_v24 = vor.u32 %v2167_v18, %v1894_v21  ;;  %v2203_v26 = vld [vmem:[%s3111_s6 + $0x1b4] sm:$0xf]  ;;  %v1966_v34 = vld [vmem:[%s3111_s6 + $0x128] sm:$0xf0]  ;;  %v2201_v35 = vld [vmem:[%s3111_s6 + $0x1a4] sm:$0xf] }
 0x13b   : > { %1367 = vmatpush.bf16.msrb.mxu3 %v2053_v38  ;;  %v2006_v38 = vld [vmem:[%s3111_s6 + $0x178] sm:$0xf0]  ;;  %v2041_v29 = vor.u32 %v2203_v26, %v2038_v27  ;;  %v2199_v45 = vld [vmem:[%s3111_s6 + $0x194] sm:$0xf] }
 0x13c   : > { %1393 = vmatpush.bf16.msra.mxu1 %v1929_v37 }
 0x13d   : > { %1353 = vmatpush.bf16.msrb.mxu2 %v1997_v41  ;;  %v2009_v41 = vor.u32 %v2195_v36, %v2006_v38  ;;  %1380 = vmatpush.bf16.msra.mxu0 %v1865_v33  ;;  %v2185_v33 = vld [vmem:[%s3111_s6 + $0x124] sm:$0xf]  ;;  %v2030_v38 = vld [vmem:[%s3111_s6 + $0x1a8] sm:$0xf0] }
 0x13e   : > { %v1969_v39 = vor.u32 %v2185_v33, %v1966_v34  ;;  %v2033_v40 = vor.u32 %v2201_v35, %v2030_v38  ;;  %v2213_v35 = vld [vmem:[%s3112_s7] sm:$0xff] }
 0x13f   : > { %1368 = vmatpush.bf16.msrb.mxu3 %v2045_v46  ;;  %v1857_v46 = vor.u32 %v2157_v43, %v1854_v44  ;;  %v2183_v43 = vld [vmem:[%s3111_s6 + $0x114] sm:$0xf]  ;;  %v1958_v44 = vld [vmem:[%s3111_s6 + $0x118] sm:$0xf0] }
 0x140   : > { %1394 = vmatpush.bf16.msra.mxu1 %v1921_v50  ;;  %v1961_v47 = vor.u32 %v2183_v43, %v1958_v44 }
 0x141   : > { %1354 = vmatpush.bf16.msrb.mxu2 %v1989_v49  ;;  %v1998_v49 = vld [vmem:[%s3111_s6 + $0x168] sm:$0xf0]  ;;  %1381 = vmatpush.bf16.msra.mxu0 %v1857_v46  ;;  %v2022_v46 = vld [vmem:[%s3111_s6 + $0x198] sm:$0xf0] }
 0x142   : > { %v2001_v51 = vor.u32 %v2193_v48, %v1998_v49  ;;  %v2025_v48 = vor.u32 %v2199_v45, %v2022_v46  ;;  %v2181_v49 = vld [vmem:[%s3111_s6 + $0x104] sm:$0xf] }
 0x143   : > { %1369 = vmatpush.bf16.msrb.mxu3 %v2037_v52  ;;  %v2209_v52 = vld [vmem:[%s3111_s6 + $0x1e4] sm:$0xf] }
 0x144   : > { %1395 = vmatpush.bf16.msra.mxu1 %v1913_v62 }
 0x145   : > { %1355 = vmatpush.bf16.msrb.mxu2 %v1981_v53  ;;  %v2062_v53 = vld [vmem:[%s3111_s6 + $0x1e8] sm:$0xf0] }
 0x146   : > { %v2065_v54 = vor.u32 %v2209_v52, %v2062_v53  ;;  %v2197_v52 = vld [vmem:[%s3111_s6 + $0x184] sm:$0xf]  ;;  %v2014_v53 = vld [vmem:[%s3111_s6 + $0x188] sm:$0xf0] }
 0x147   : > { %1370 = vmatpush.bf16.msrb.mxu3 %v2029_v5  ;;  %v2169_v5 = vld [vmem:[%s3111_s6 + $0xa4] sm:$0xf] }
 0x148   : > { %v1905_v10 = vor.u32 %v2169_v5, %v1902_v7 }
 0x149   : > { %1356 = vmatpush.bf16.msrb.mxu2 %v1973_v56  ;;  %v1846_v56 = vld [vmem:[%s3111_s6 + $0x38] sm:$0xf0] }
 0x14a   : > { %v1849_v58 = vor.u32 %v2155_v55, %v1846_v56  ;;  %1396 = vmatpush.bf16.msra.mxu1 %v1905_v10  ;;  %v2017_v56 = vor.u32 %v2197_v52, %v2014_v53 }
 0x14b   : > { %1371 = vmatpush.bf16.msrb.mxu3 %v2021_v20  ;;  %v1833_v20 = vor.u32 %v2151_v15, %v1830_v16 }
 0x14c   : > { %1382 = vmatpush.bf16.msra.mxu0 %v1849_v58 }
 0x14d   : > { %1357 = vmatpush.bf16.msrb.mxu2 %v1965_v1  ;;  %v2054_v1 = vld [vmem:[%s3111_s6 + $0x1d8] sm:$0xf0] }
 0x14e   : > { %v2057_v2 = vor.u32 %v2207_v0, %v2054_v1  ;;  %1397 = vmatpush.bf16.msra.mxu1 %v1897_v24 }
 0x14f   : > { %1372 = vmatpush.bf16.msrb.mxu3 %v2013_v32  ;;  %v1886_v32 = vld [vmem:[%s3111_s6 + $0x88] sm:$0xf0] }
 0x150   : > { %1383 = vmatpush.bf16.msra.mxu0 %v1841_v6  ;;  %v1889_v37 = vor.u32 %v2165_v31, %v1886_v32 }
 0x151   : > { %1358 = vmatpush.bf16.msrb.mxu2 %v1957_v14  ;;  %v2049_v14 = vor.u32 %v2205_v12, %v2046_v13 }
 0x152   : > { %1398 = vmatpush.bf16.msra.mxu1 %v1889_v37 }
 0x153   : > { %1417 = vmatpush.bf16.msra.mxu3 %v2073_v42  ;;  %v867_v42 = vpop.permute.xlu1 %866 }
 0x154   : > { %1384 = vmatpush.bf16.msra.mxu0 %v1833_v20 }
 0x155   : > { %1359 = vmatpush.bf16.msrb.mxu2 %v1949_v28  ;;  %v2149_v28 = vld [vmem:[%s3111_s6 + $0x4] sm:$0xf] }
 0x156   : > { %v1825_v36 = vor.u32 %v2149_v28, %v1822_v30 }
 0x157   : > { %1418 = vmatpush.bf16.msra.mxu3 %v2065_v54 }
 0x158   : > { %1385 = vmatpush.bf16.msra.mxu0 %v1825_v36 }
 0x159   : > { %1404 = vmatpush.bf16.msra.mxu2 %v2009_v41 }
 0x15b   : > { %1419 = vmatpush.bf16.msra.mxu3 %v2057_v2 }
 0x15d   : > { %1405 = vmatpush.bf16.msra.mxu2 %v2001_v51  ;;  %v1950_v51 = vld [vmem:[%s3111_s6 + $0x108] sm:$0xf0] }
 0x15e   : > { %v1953_v55 = vor.u32 %v2181_v49, %v1950_v51 }
 0x15f   : > { %1420 = vmatpush.bf16.msra.mxu3 %v2049_v14 }
 0x161   : > { %1406 = vmatpush.bf16.msra.mxu2 %v1993_v63 }
 0x163   : > { %1421 = vmatpush.bf16.msra.mxu3 %v2041_v29 }
 0x165   : > { %1407 = vmatpush.bf16.msra.mxu2 %v1985_v11 }
 0x167   : > { %1422 = vmatpush.bf16.msra.mxu3 %v2033_v40 }
 0x169   : > { %1408 = vmatpush.bf16.msra.mxu2 %v1977_v25 }
 0x16b   : > { %1423 = vmatpush.bf16.msra.mxu3 %v2025_v48 }
 0x16d   : > { %1409 = vmatpush.bf16.msra.mxu2 %v1969_v39 }
 0x16f   : > { %1424 = vmatpush.bf16.msra.mxu3 %v2017_v56 }
 0x171   : > { %1410 = vmatpush.bf16.msra.mxu2 %v1961_v47 }
 0x175   : > { %1411 = vmatpush.bf16.msra.mxu2 %v1953_v55 }
 0x1b5   : > { %v905_v41 = vpop.f32.mrf.mxu3 }
 0x1b6   : > { %v906_v50 = vadd.f32 %v905_v41, %v867_v42 }
 0x1b8   : > { %v915_v57 = vmul.f32 0.01, %v906_v50  ;;  %vm911_vm3 = vcmp.gt.f32.partialorder %v906_v50, 0.0 }
 0x1ba   : > { %v919_v62 = vsel %vm911_vm3, %v906_v50, %v915_v57 }
 0x1bb   : > { %v891_v54 = vpop.f32.mrf.mxu2 }
 0x1bc   : > { %v892_v58 = vadd.f32 %v891_v54, %v867_v42 }
 0x1bd   : > { %v907_v59 = vpop.f32.mrf.mxu3 }
 0x1be   : > { %vm910_vm4 = vcmp.gt.f32.partialorder %v892_v58, 0.0  ;;  %v914_v60 = vmul.f32 0.01, %v892_v58  ;;  %v908_v0 = vadd.f32 %v907_v59, %v872_v61 }
 0x1c0   : > { %v918_v63 = vsel %vm910_vm4, %v892_v58, %v914_v60  ;;  %v917_v5 = vmul.f32 0.01, %v908_v0  ;;  %vm913_vm5 = vcmp.gt.f32.partialorder %v908_v0, 0.0 }
 0x1c1   : > { %v922_v1 = vpack.c.bf16 %v919_v62, %v918_v63 }
 0x1c2   : > { %v921_v10 = vsel %vm913_vm5, %v908_v0, %v917_v5 }
 0x1c3   : > { %v893_v2 = vpop.f32.mrf.mxu2  ;;  %v994_v3 = vunpack.c.l.b16 %v922_v1  ;;  %v995_v4 = vunpack.c.h.b16 %v922_v1 }
 0x1c4   : > { %v894_v6 = vadd.f32 %v893_v2, %v872_v61 }
 0x1c5   : > { %v998_v7 = vpack.c.b16 %v994_v3, %v994_v3  ;;  %v999_v8 = vpack.c.b16 %v995_v4, %v995_v4 }
 0x1c6   : > { %vm912_vm6 = vcmp.gt.f32.partialorder %v894_v6, 0.0  ;;  %v916_v9 = vmul.f32 0.01, %v894_v6 }
 0x1c7   : > { %1334 = vmatmul.bf16.vlgmr.msrb.gmra.mxu0 %v998_v7  ;;  %1347 = vmatmul.bf16.vlgmr.msrb.gmra.mxu1 %v999_v8 }
 0x1c8   : > { %v920_v11 = vsel %vm912_vm6, %v894_v6, %v916_v9 }
 0x1c9   : > { %v924_v12 = vpack.c.bf16 %v921_v10, %v920_v11 }
 0x1cb   : > { %v996_v13 = vunpack.c.l.b16 %v924_v12  ;;  %v997_v14 = vunpack.c.h.b16 %v924_v12 }
 0x1cd   : > { %v1000_v15 = vpack.c.b16 %v996_v13, %v996_v13  ;;  %v1001_v16 = vpack.c.b16 %v997_v14, %v997_v14 }
 0x1cf   : > { %1360 = vmatmul.bf16.vlgmr.msrb.gmra.mxu2 %v1000_v15  ;;  %1373 = vmatmul.bf16.vlgmr.msrb.gmra.mxu3 %v1001_v16 }
 0x1d7   : > { %1386 = vmatmul.bf16.vlgmr.msra.gmra.mxu0 %v998_v7  ;;  %1399 = vmatmul.bf16.vlgmr.msra.gmra.mxu1 %v999_v8 }
 0x1df   : > { %1412 = vmatmul.bf16.vlgmr.msra.gmra.mxu2 %v1000_v15  ;;  %1425 = vmatmul.bf16.vlgmr.msra.gmra.mxu3 %v1001_v16 }
 0x244   : > { %v1335_v18 = vpop.f32.mrf.mxu0  ;;  %v1348_v20 = vpop.f32.mrf.mxu1 }
 0x245   : > { %v1349_v23 = vadd.f32 %v1348_v20, %v1335_v18 }
 0x24c   : > { %v1337_v21 = vpop.f32.mrf.mxu0  ;;  %v1350_v22 = vpop.f32.mrf.mxu1 }
 0x252   : > { %v1361_v24 = vpop.f32.mrf.mxu2  ;;  %v1374_v25 = vpop.f32.mrf.mxu3 }
 0x253   : > { %v1362_v26 = vadd.f32 %v1361_v24, %v1349_v23 }
 0x254   : > { %v1387_v27 = vpop.f32.mrf.mxu0  ;;  %v1400_v28 = vpop.f32.mrf.mxu1 }
 0x255   : > { %v1375_v29 = vadd.f32 %v1374_v25, %v1362_v26  ;;  %v1401_v38 = vadd.f32 %v1400_v28, %v1387_v27 }
 0x257   : > { %v1432_v30 = vadd.f32 %v1375_v29, %v2690_v17 }
 0x259   : > { %v1440_v31 = vpack.c.bf16 %v1432_v30, %v1432_v30 }
 0x25a   : > { %v1363_v32 = vpop.f32.mrf.mxu2  ;;  %v1376_v33 = vpop.f32.mrf.mxu3 }
 0x25b   : > { %v1453_v34 = vsel %vm1451_vm7, %v1440_v31, 0 }
 0x25c   : > { %v1389_v36 = vpop.f32.mrf.mxu0  ;;  %v1402_v37 = vpop.f32.mrf.mxu1  ;;  %1465 = vmatpush.bf16.msrb.mxu0 %v1453_v34 }
 0x25f   : > { %2078 = vmatmul.msk.bf16.vlgmr.msrb.gmra.mxu0 %vm1447_vm8, %v2213_v35 }
 0x262   : > { %v1413_v39 = vpop.f32.mrf.mxu2  ;;  %v1426_v40 = vpop.f32.mrf.mxu3 }
 0x263   : > { %v1414_v17 = vadd.f32 %v1413_v39, %v1401_v38 }
 0x265   : > { %v1427_v41 = vadd.f32 %v1426_v40, %v1414_v17 }
 0x267   : > { %v1433_v42 = vadd.f32 %v1427_v41, %v2694_v19 }
 0x269   : > { %v1441_v43 = vpack.c.bf16 %v1433_v42, %v1433_v42 }
 0x26a   : > { %v1415_v44 = vpop.f32.mrf.mxu2  ;;  %v1428_v45 = vpop.f32.mrf.mxu3 }
 0x26b   : > { %v1456_v46 = vsel %vm1451_vm7, %v1441_v43, 0 }
 0x26c   : > { %1479 = vmatpush.bf16.msrb.mxu1 %v1456_v46 }
 0x26f   : > { %2079 = vmatmul.msk.bf16.vlgmr.msrb.gmra.mxu1 %vm1447_vm8, %v2213_v35 }
 0x2dc   : > { %v1467_v47 = vpop.f32.mrf.mxu0 }
 0x2dd   : > { %1486 = vst [vmem:[%s305_s24] sm:$0xff] %v1467_v47 }
 0x2e4   : > { %v1469_v48 = vpop.f32.mrf.mxu0 }
 0x2e5   : > { %1488 = vst [vmem:[%s305_s24 + $0x10] sm:$0xff] %v1469_v48 }
 0x2ec   : > { %v1481_v49 = vpop.f32.mrf.mxu1 }
 0x2ed   : > { %1487 = vst [vmem:[%s305_s24 + $0x8] sm:$0xff] %v1481_v49 }
 0x2f4   : > { %v1483_v50 = vpop.f32.mrf.mxu1 }
 0x2f5   : > { %1489 = vst [vmem:[%s305_s24 + $0x18] sm:$0xff] %v1483_v50 }
 0x2f6 PF: > { %s18_s27 = sadd.s32 1, %s2231_s27  }
 0x2f7   : > { %p15_p4 = scmp.ge.s32.totalorder %s18_s27, 4  }
 0x2f9   :  { %17 = sbr.rel (!%p15_p4) target bundleno = 1 (0x1), region = 82 }

</bundles_post_ra>
